<compile_context>
chip_gen: v7x
topology: tpu7x:2x2x1
jax: 0.10.0
libtpu: 0.0.40
codegen_flags: <defaults>
</compile_context>

<pallas_src>
import functools

import jax
import jax.numpy as jnp
import numpy as np
from jax import lax
from jax.experimental import pallas as pl
from jax.experimental.pallas import tpu as pltpu


def features_kernel(x_ref, w_ref, b_ref, mask_ref, pool_ref, out_ref,
                    fp_ref, col_ref, *, H, W, kH, kW):
    """conv3x3(pad=1) + ReLU + global average pool for a block of Bt images.

    x_ref:    (Bt, Cin, H*W)          raw NCHW bytes (flattened spatial)
    w_ref:    (Cout, kH*kW*Cin)       conv weight, K ordered (kh, kw, ci)
    b_ref:    (Cout, 1)               conv bias (column, lane-broadcastable)
    mask_ref: (kW, H*W)               per-kw masks for wrapped w-border columns
    pool_ref: (Bt*H*W, Bt)            block-diagonal 1/HW pooling matrix
    out_ref:  (1, Cout, Bt)           pooled features for this image block
    fp_ref:   (Bt, Cin, H*W + 2*base) flat scratch with zero h-borders
    col_ref:  (kH*kW*Cin, Bt*H*W)     im2col patch matrix scratch
    """
    Bt, Cin, HW = x_ref.shape
    Cout = w_ref.shape[0]
    pad_h, pad_w = (kH - 1) // 2, (kW - 1) // 2
    base = pad_h * W + pad_w

    # ---- zero-pad folded into the kernel: touch ONLY the 2*base border ------
    # columns (interior fully overwritten below).  Re-done every step so it is
    # independent of which TensorCore runs which grid step.
    if base > 0:
        border = jnp.zeros((Bt, Cin, base), jnp.float32)
        fp_ref[:, :, :base] = border
        fp_ref[:, :, base + HW:] = border
    fp_ref[:, :, base:base + HW] = x_ref[...].astype(jnp.float32)

    # ---- im2col: (K, Bt*HW) patch matrix from kH*kW shifted lane-slices -----
    # Tap (kh, kw) of image bi is the flat window starting at base + dh*W + dw;
    # the only wrong entries of that shifted slice are the wrapped w-border
    # columns, zeroed by the precomputed mask (true zero padding).
    for kh in range(kH):
        for kw in range(kW):
            dh, dw = kh - pad_h, kw - pad_w
            start = base + dh * W + dw                       # static, >= 0
            t = kh * kW + kw
            for bi in range(Bt):
                s = fp_ref[bi, :, start:start + HW]          # (Cin, HW), f32
                if dw != 0:
                    s = s * mask_ref[kw:kw + 1, :]           # zero wrapped cols
                col_ref[t * Cin:(t + 1) * Cin,
                        bi * HW:(bi + 1) * HW] = s.astype(col_ref.dtype)

    # ---- conv for the whole image block: ONE lane-dense MXU matmul ----------
    acc = jnp.dot(w_ref[...], col_ref[...],
                  preferred_element_type=jnp.float32)        # (Cout, Bt*HW)
    acc = jnp.maximum(acc + b_ref[...].astype(jnp.float32), 0.0)   # bias + ReLU

    # ---- AdaptiveAvgPool2d(1) + Flatten for all Bt images in one push -------
    # Block-diagonal pooling matrix gives the whole (Cout, Bt) slab, stored once
    # (no per-image cross-lane reduction / masked size-1 stores).
    pooled = jnp.dot(acc, pool_ref[...], preferred_element_type=jnp.float32)
    out_ref[...] = pooled.reshape(1, Cout, Bt).astype(out_ref.dtype)


def _num_grid_steps(B):
    """grid=(1,) on single-TC chips (v5e/v6e); >= 2 steps on v7x (2 TCs/chip)."""
    try:
        kind = jax.devices()[0].device_kind.lower()
    except Exception:
        kind = ""
    if "v7" in kind and B >= 2 and B % 2 == 0:
        return 2
    return 1


def model_without_last_layer(x_nchw, w_oihw, b, *, matmul_dtype=jnp.float32,
                             num_grid_steps=None):
    """PyTorch NCHW input / OIHW weight in, (B, Cout) pooled features out."""
    B, Cin, H, W = x_nchw.shape
    Cout, _, kH, kW = w_oihw.shape
    K = kH * kW * Cin
    HW = H * W
    pad_h, pad_w = (kH - 1) // 2, (kW - 1) // 2
    base = pad_h * W + pad_w

    n_steps = _num_grid_steps(B) if num_grid_steps is None else num_grid_steps
    if n_steps < 1 or B % n_steps != 0:
        n_steps = 1
    Bt = B // n_steps

    # Free metadata reshape of the raw NCHW bytes (no pad / no transpose of x).
    x_flat = x_nchw.reshape(B, Cin, HW)
    # Tiny one-time parameter re-layout: OIHW -> (Cout, K), K = (kh, kw, ci).
    w_mat = jnp.transpose(w_oihw, (0, 2, 3, 1)).reshape(Cout, K).astype(matmul_dtype)
    b_col = b.reshape(Cout, 1).astype(jnp.float32)

    # Per-kw masks for the wrapped w-border columns (trace-time 0/1 constants).
    w_idx = np.arange(HW) % W
    edge_mask = np.stack(
        [((w_idx + (kw - pad_w) >= 0) & (w_idx + (kw - pad_w) < W))
         for kw in range(kW)], axis=0).astype(np.float32)
    edge_mask = jnp.asarray(edge_mask)

    # Block-diagonal per-image mean-pooling matrix (trace-time constant).
    pool_np = np.zeros((Bt * HW, Bt), np.float32)
    for bi in range(Bt):
        pool_np[bi * HW:(bi + 1) * HW, bi] = 1.0 / HW
    pool_mat = jnp.asarray(pool_np)

    kernel = functools.partial(features_kernel, H=H, W=W, kH=kH, kW=kW)

    itemsize = jnp.dtype(x_nchw.dtype).itemsize
    cost = pl.CostEstimate(
        flops=2 * B * Cout * K * HW + 2 * B * Cout * HW,
        transcendentals=0,
        bytes_accessed=(x_flat.size * itemsize
                        + w_mat.size * jnp.dtype(matmul_dtype).itemsize
                        + (b_col.size + edge_mask.size + pool_mat.size) * 4
                        + n_steps * Cout * Bt * itemsize))

    out = pl.pallas_call(
        kernel,
        out_shape=jax.ShapeDtypeStruct((n_steps, Cout, Bt), x_nchw.dtype),
        grid=(n_steps,),
        in_specs=[
            pl.BlockSpec((Bt, Cin, HW), lambda i: (i, 0, 0)),   # x image block
            pl.BlockSpec((Cout, K), lambda i: (0, 0)),          # weight matrix
            pl.BlockSpec((Cout, 1), lambda i: (0, 0)),          # bias column
            pl.BlockSpec((kW, HW), lambda i: (0, 0)),           # border masks
            pl.BlockSpec((Bt * HW, Bt), lambda i: (0, 0)),      # pooling matrix
        ],
        out_specs=pl.BlockSpec((1, Cout, Bt), lambda i: (i, 0, 0)),
        scratch_shapes=[
            pltpu.VMEM((Bt, Cin, HW + 2 * base), jnp.float32),  # flat padded x
            pltpu.VMEM((K, Bt * HW), matmul_dtype),             # im2col matrix
        ],
        compiler_params=pltpu.CompilerParams(
            dimension_semantics=("parallel",)),                 # v7x: both TCs
        cost_estimate=cost,
    )(x_flat, w_mat, b_col, edge_mask, pool_mat)

    # (n_steps, Cout, Bt) -> (B, Cout); image index b = step*Bt + bi.
    return jnp.transpose(out, (0, 2, 1)).reshape(B, Cout)


def _reference(x_nchw, w_oihw, b):
    """Pure-JAX reference of the stripped model (conv -> relu -> gap -> flatten)."""
    kH, kW = w_oihw.shape[2], w_oihw.shape[3]
    pad_h, pad_w = (kH - 1) // 2, (kW - 1) // 2
    y = lax.conv_general_dilated(
        x_nchw.astype(jnp.float32), w_oihw.astype(jnp.float32),
        window_strides=(1, 1), padding=((pad_h, pad_h), (pad_w, pad_w)),
        dimension_numbers=("NCHW", "OIHW", "NCHW"))
    y = y + b.reshape(1, -1, 1, 1)
    y = jnp.maximum(y, 0.0)
    return jnp.mean(y, axis=(2, 3))                               # (B, Cout)


if __name__ == "__main__":
    key = jax.random.PRNGKey(0)
    k_x, k_w, k_b = jax.random.split(key, 3)

    B, Cin, H, W = 2, 4, 16, 16
    Cout, kH, kW = 8, 3, 3

    # Deterministic synthetic parameters (PyTorch shapes: OIHW weight, (Cout,) bias).
    x = jax.random.normal(k_x, (B, Cin, H, W), dtype=jnp.float32)
    w = jax.random.normal(k_w, (Cout, Cin, kH, kW), dtype=jnp.float32) * 0.1
    bias = jax.random.normal(k_b, (Cout,), dtype=jnp.float32) * 0.1

    out = jax.block_until_ready(model_without_last_layer(x, w, bias))
    ref = jax.block_until_ready(_reference(x, w, bias))

    assert out.shape == (B, Cout), out.shape
    np.testing.assert_allclose(np.asarray(out), np.asarray(ref),
                               rtol=1e-4, atol=1e-4)
    print("KERNEL_OK")
</pallas_src>

<mosaic_0001>
module attributes {stable_mosaic.version = 11 : i64} {
  func.func @features_kernel(%arg0: i32, %arg1: memref<2x4x256xf32, #tpu.memory_space<vmem>>, %arg2: memref<8x36xf32, #tpu.memory_space<vmem>>, %arg3: memref<8x1xf32, #tpu.memory_space<vmem>>, %arg4: memref<3x256xf32, #tpu.memory_space<vmem>>, %arg5: memref<512x2xf32, #tpu.memory_space<vmem>>, %arg6: memref<1x8x2xf32, #tpu.memory_space<vmem>>, %arg7: memref<2x4x290xf32, #tpu.memory_space<vmem>>, %arg8: memref<36x512xf32, #tpu.memory_space<vmem>>) attributes {dimension_semantics = [#tpu.dimension_semantics<parallel>], iteration_bounds = array<i64: 1>, scalar_prefetch = 0 : i64, scratch_operands = 2 : i64, tpu.core_type = #tpu.core_type<tc>, window_params = [{transform_indices = @transform_0, window_bounds = array<i64: 2, 4, 256>}, {pipeline_mode = #tpu.pipeline_mode<synchronous>, transform_indices = @transform_1, window_bounds = array<i64: 8, 36>}, {pipeline_mode = #tpu.pipeline_mode<synchronous>, transform_indices = @transform_2, window_bounds = array<i64: 8, 1>}, {pipeline_mode = #tpu.pipeline_mode<synchronous>, transform_indices = @transform_3, window_bounds = array<i64: 3, 256>}, {pipeline_mode = #tpu.pipeline_mode<synchronous>, transform_indices = @transform_4, window_bounds = array<i64: 512, 2>}, {transform_indices = @transform_5, window_bounds = array<i64: 1, 8, 2>}]} {
    %cst = arith.constant 0.000000e+00 : f32
    %0 = vector.broadcast %cst : f32 to vector<2x4x17xf32>
    %c0 = arith.constant 0 : index
    %c0_0 = arith.constant 0 : index
    %c0_1 = arith.constant 0 : index
    %1 = vector.load %arg7[%c0, %c0_0, %c0_1] : memref<2x4x290xf32, #tpu.memory_space<vmem>>, vector<2x4x17xf32>
    tpu.vector_store %arg7[%c0, %c0_0, %c0_1], %0 {strides = array<i32>} : memref<2x4x290xf32, #tpu.memory_space<vmem>>, vector<2x4x17xf32>,
    %c0_2 = arith.constant 0 : index
    %c0_3 = arith.constant 0 : index
    %c273 = arith.constant 273 : index
    %2 = vector.load %arg7[%c0_2, %c0_3, %c273] : memref<2x4x290xf32, #tpu.memory_space<vmem>>, vector<2x4x17xf32>
    tpu.vector_store %arg7[%c0_2, %c0_3, %c273], %0 {strides = array<i32>} : memref<2x4x290xf32, #tpu.memory_space<vmem>>, vector<2x4x17xf32>,
    %c0_4 = arith.constant 0 : index
    %c0_5 = arith.constant 0 : index
    %c0_6 = arith.constant 0 : index
    %3 = vector.load %arg1[%c0_4, %c0_5, %c0_6] : memref<2x4x256xf32, #tpu.memory_space<vmem>>, vector<2x4x256xf32>
    %c0_7 = arith.constant 0 : index
    %c0_8 = arith.constant 0 : index
    %c17 = arith.constant 17 : index
    %4 = vector.load %arg7[%c0_7, %c0_8, %c17] : memref<2x4x290xf32, #tpu.memory_space<vmem>>, vector<2x4x256xf32>
    tpu.vector_store %arg7[%c0_7, %c0_8, %c17], %3 {strides = array<i32>} : memref<2x4x290xf32, #tpu.memory_space<vmem>>, vector<2x4x256xf32>,
    %c0_9 = arith.constant 0 : index
    %c0_10 = arith.constant 0 : index
    %c0_11 = arith.constant 0 : index
    %5 = vector.load %arg7[%c0_9, %c0_10, %c0_11] : memref<2x4x290xf32, #tpu.memory_space<vmem>>, vector<1x4x256xf32>
    %6 = vector.shape_cast %5 : vector<1x4x256xf32> to vector<4x256xf32>
    %c0_12 = arith.constant 0 : index
    %c0_13 = arith.constant 0 : index
    %7 = vector.load %arg4[%c0_12, %c0_13] : memref<3x256xf32, #tpu.memory_space<vmem>>, vector<1x256xf32>
    %8 = vector.broadcast %7 : vector<1x256xf32> to vector<4x256xf32>
    %9 = arith.mulf %6, %8 : vector<4x256xf32>
    %c0_14 = arith.constant 0 : index
    %c0_15 = arith.constant 0 : index
    %10 = vector.load %arg8[%c0_14, %c0_15] : memref<36x512xf32, #tpu.memory_space<vmem>>, vector<4x256xf32>
    tpu.vector_store %arg8[%c0_14, %c0_15], %9 {strides = array<i32>} : memref<36x512xf32, #tpu.memory_space<vmem>>, vector<4x256xf32>,
    %c1 = arith.constant 1 : index
    %c0_16 = arith.constant 0 : index
    %c0_17 = arith.constant 0 : index
    %11 = vector.load %arg7[%c1, %c0_16, %c0_17] : memref<2x4x290xf32, #tpu.memory_space<vmem>>, vector<1x4x256xf32>
    %12 = vector.shape_cast %11 : vector<1x4x256xf32> to vector<4x256xf32>
    %c0_18 = arith.constant 0 : index
    %c0_19 = arith.constant 0 : index
    %13 = vector.load %arg4[%c0_18, %c0_19] : memref<3x256xf32, #tpu.memory_space<vmem>>, vector<1x256xf32>
    %14 = vector.broadcast %13 : vector<1x256xf32> to vector<4x256xf32>
    %15 = arith.mulf %12, %14 : vector<4x256xf32>
    %c0_20 = arith.constant 0 : index
    %c256 = arith.constant 256 : index
    %16 = vector.load %arg8[%c0_20, %c256] : memref<36x512xf32, #tpu.memory_space<vmem>>, vector<4x256xf32>
    tpu.vector_store %arg8[%c0_20, %c256], %15 {strides = array<i32>} : memref<36x512xf32, #tpu.memory_space<vmem>>, vector<4x256xf32>,
    %c0_21 = arith.constant 0 : index
    %c0_22 = arith.constant 0 : index
    %c1_23 = arith.constant 1 : index
    %17 = vector.load %arg7[%c0_21, %c0_22, %c1_23] : memref<2x4x290xf32, #tpu.memory_space<vmem>>, vector<1x4x256xf32>
    %18 = vector.shape_cast %17 : vector<1x4x256xf32> to vector<4x256xf32>
    %c4 = arith.constant 4 : index
    %c0_24 = arith.constant 0 : index
    %19 = vector.load %arg8[%c4, %c0_24] : memref<36x512xf32, #tpu.memory_space<vmem>>, vector<4x256xf32>
    tpu.vector_store %arg8[%c4, %c0_24], %18 {strides = array<i32>} : memref<36x512xf32, #tpu.memory_space<vmem>>, vector<4x256xf32>,
    %c1_25 = arith.constant 1 : index
    %c0_26 = arith.constant 0 : index
    %c1_27 = arith.constant 1 : index
    %20 = vector.load %arg7[%c1_25, %c0_26, %c1_27] : memref<2x4x290xf32, #tpu.memory_space<vmem>>, vector<1x4x256xf32>
    %21 = vector.shape_cast %20 : vector<1x4x256xf32> to vector<4x256xf32>
    %c4_28 = arith.constant 4 : index
    %c256_29 = arith.constant 256 : index
    %22 = vector.load %arg8[%c4_28, %c256_29] : memref<36x512xf32, #tpu.memory_space<vmem>>, vector<4x256xf32>
    tpu.vector_store %arg8[%c4_28, %c256_29], %21 {strides = array<i32>} : memref<36x512xf32, #tpu.memory_space<vmem>>, vector<4x256xf32>,
    %c0_30 = arith.constant 0 : index
    %c0_31 = arith.constant 0 : index
    %c2 = arith.constant 2 : index
    %23 = vector.load %arg7[%c0_30, %c0_31, %c2] : memref<2x4x290xf32, #tpu.memory_space<vmem>>, vector<1x4x256xf32>
    %24 = vector.shape_cast %23 : vector<1x4x256xf32> to vector<4x256xf32>
    %c2_32 = arith.constant 2 : index
    %c0_33 = arith.constant 0 : index
    %25 = vector.load %arg4[%c2_32, %c0_33] : memref<3x256xf32, #tpu.memory_space<vmem>>, vector<1x256xf32>
    %26 = vector.broadcast %25 : vector<1x256xf32> to vector<4x256xf32>
    %27 = arith.mulf %24, %26 : vector<4x256xf32>
    %c8 = arith.constant 8 : index
    %c0_34 = arith.constant 0 : index
    %28 = vector.load %arg8[%c8, %c0_34] : memref<36x512xf32, #tpu.memory_space<vmem>>, vector<4x256xf32>
    tpu.vector_store %arg8[%c8, %c0_34], %27 {strides = array<i32>} : memref<36x512xf32, #tpu.memory_space<vmem>>, vector<4x256xf32>,
    %c1_35 = arith.constant 1 : index
    %c0_36 = arith.constant 0 : index
    %c2_37 = arith.constant 2 : index
    %29 = vector.load %arg7[%c1_35, %c0_36, %c2_37] : memref<2x4x290xf32, #tpu.memory_space<vmem>>, vector<1x4x256xf32>
    %30 = vector.shape_cast %29 : vector<1x4x256xf32> to vector<4x256xf32>
    %c2_38 = arith.constant 2 : index
    %c0_39 = arith.constant 0 : index
    %31 = vector.load %arg4[%c2_38, %c0_39] : memref<3x256xf32, #tpu.memory_space<vmem>>, vector<1x256xf32>
    %32 = vector.broadcast %31 : vector<1x256xf32> to vector<4x256xf32>
    %33 = arith.mulf %30, %32 : vector<4x256xf32>
    %c8_40 = arith.constant 8 : index
    %c256_41 = arith.constant 256 : index
    %34 = vector.load %arg8[%c8_40, %c256_41] : memref<36x512xf32, #tpu.memory_space<vmem>>, vector<4x256xf32>
    tpu.vector_store %arg8[%c8_40, %c256_41], %33 {strides = array<i32>} : memref<36x512xf32, #tpu.memory_space<vmem>>, vector<4x256xf32>,
    %c0_42 = arith.constant 0 : index
    %c0_43 = arith.constant 0 : index
    %c16 = arith.constant 16 : index
    %35 = vector.load %arg7[%c0_42, %c0_43, %c16] : memref<2x4x290xf32, #tpu.memory_space<vmem>>, vector<1x4x256xf32>
    %36 = vector.shape_cast %35 : vector<1x4x256xf32> to vector<4x256xf32>
    %c0_44 = arith.constant 0 : index
    %c0_45 = arith.constant 0 : index
    %37 = vector.load %arg4[%c0_44, %c0_45] : memref<3x256xf32, #tpu.memory_space<vmem>>, vector<1x256xf32>
    %38 = vector.broadcast %37 : vector<1x256xf32> to vector<4x256xf32>
    %39 = arith.mulf %36, %38 : vector<4x256xf32>
    %c12 = arith.constant 12 : index
    %c0_46 = arith.constant 0 : index
    %40 = vector.load %arg8[%c12, %c0_46] : memref<36x512xf32, #tpu.memory_space<vmem>>, vector<4x256xf32>
    tpu.vector_store %arg8[%c12, %c0_46], %39 {strides = array<i32>} : memref<36x512xf32, #tpu.memory_space<vmem>>, vector<4x256xf32>,
    %c1_47 = arith.constant 1 : index
    %c0_48 = arith.constant 0 : index
    %c16_49 = arith.constant 16 : index
    %41 = vector.load %arg7[%c1_47, %c0_48, %c16_49] : memref<2x4x290xf32, #tpu.memory_space<vmem>>, vector<1x4x256xf32>
    %42 = vector.shape_cast %41 : vector<1x4x256xf32> to vector<4x256xf32>
    %c0_50 = arith.constant 0 : index
    %c0_51 = arith.constant 0 : index
    %43 = vector.load %arg4[%c0_50, %c0_51] : memref<3x256xf32, #tpu.memory_space<vmem>>, vector<1x256xf32>
    %44 = vector.broadcast %43 : vector<1x256xf32> to vector<4x256xf32>
    %45 = arith.mulf %42, %44 : vector<4x256xf32>
    %c12_52 = arith.constant 12 : index
    %c256_53 = arith.constant 256 : index
    %46 = vector.load %arg8[%c12_52, %c256_53] : memref<36x512xf32, #tpu.memory_space<vmem>>, vector<4x256xf32>
    tpu.vector_store %arg8[%c12_52, %c256_53], %45 {strides = array<i32>} : memref<36x512xf32, #tpu.memory_space<vmem>>, vector<4x256xf32>,
    %c0_54 = arith.constant 0 : index
    %c0_55 = arith.constant 0 : index
    %c17_56 = arith.constant 17 : index
    %47 = vector.load %arg7[%c0_54, %c0_55, %c17_56] : memref<2x4x290xf32, #tpu.memory_space<vmem>>, vector<1x4x256xf32>
    %48 = vector.shape_cast %47 : vector<1x4x256xf32> to vector<4x256xf32>
    %c16_57 = arith.constant 16 : index
    %c0_58 = arith.constant 0 : index
    %49 = vector.load %arg8[%c16_57, %c0_58] : memref<36x512xf32, #tpu.memory_space<vmem>>, vector<4x256xf32>
    tpu.vector_store %arg8[%c16_57, %c0_58], %48 {strides = array<i32>} : memref<36x512xf32, #tpu.memory_space<vmem>>, vector<4x256xf32>,
    %c1_59 = arith.constant 1 : index
    %c0_60 = arith.constant 0 : index
    %c17_61 = arith.constant 17 : index
    %50 = vector.load %arg7[%c1_59, %c0_60, %c17_61] : memref<2x4x290xf32, #tpu.memory_space<vmem>>, vector<1x4x256xf32>
    %51 = vector.shape_cast %50 : vector<1x4x256xf32> to vector<4x256xf32>
    %c16_62 = arith.constant 16 : index
    %c256_63 = arith.constant 256 : index
    %52 = vector.load %arg8[%c16_62, %c256_63] : memref<36x512xf32, #tpu.memory_space<vmem>>, vector<4x256xf32>
    tpu.vector_store %arg8[%c16_62, %c256_63], %51 {strides = array<i32>} : memref<36x512xf32, #tpu.memory_space<vmem>>, vector<4x256xf32>,
    %c0_64 = arith.constant 0 : index
    %c0_65 = arith.constant 0 : index
    %c18 = arith.constant 18 : index
    %53 = vector.load %arg7[%c0_64, %c0_65, %c18] : memref<2x4x290xf32, #tpu.memory_space<vmem>>, vector<1x4x256xf32>
    %54 = vector.shape_cast %53 : vector<1x4x256xf32> to vector<4x256xf32>
    %c2_66 = arith.constant 2 : index
    %c0_67 = arith.constant 0 : index
    %55 = vector.load %arg4[%c2_66, %c0_67] : memref<3x256xf32, #tpu.memory_space<vmem>>, vector<1x256xf32>
    %56 = vector.broadcast %55 : vector<1x256xf32> to vector<4x256xf32>
    %57 = arith.mulf %54, %56 : vector<4x256xf32>
    %c20 = arith.constant 20 : index
    %c0_68 = arith.constant 0 : index
    %58 = vector.load %arg8[%c20, %c0_68] : memref<36x512xf32, #tpu.memory_space<vmem>>, vector<4x256xf32>
    tpu.vector_store %arg8[%c20, %c0_68], %57 {strides = array<i32>} : memref<36x512xf32, #tpu.memory_space<vmem>>, vector<4x256xf32>,
    %c1_69 = arith.constant 1 : index
    %c0_70 = arith.constant 0 : index
    %c18_71 = arith.constant 18 : index
    %59 = vector.load %arg7[%c1_69, %c0_70, %c18_71] : memref<2x4x290xf32, #tpu.memory_space<vmem>>, vector<1x4x256xf32>
    %60 = vector.shape_cast %59 : vector<1x4x256xf32> to vector<4x256xf32>
    %c2_72 = arith.constant 2 : index
    %c0_73 = arith.constant 0 : index
    %61 = vector.load %arg4[%c2_72, %c0_73] : memref<3x256xf32, #tpu.memory_space<vmem>>, vector<1x256xf32>
    %62 = vector.broadcast %61 : vector<1x256xf32> to vector<4x256xf32>
    %63 = arith.mulf %60, %62 : vector<4x256xf32>
    %c20_74 = arith.constant 20 : index
    %c256_75 = arith.constant 256 : index
    %64 = vector.load %arg8[%c20_74, %c256_75] : memref<36x512xf32, #tpu.memory_space<vmem>>, vector<4x256xf32>
    tpu.vector_store %arg8[%c20_74, %c256_75], %63 {strides = array<i32>} : memref<36x512xf32, #tpu.memory_space<vmem>>, vector<4x256xf32>,
    %c0_76 = arith.constant 0 : index
    %c0_77 = arith.constant 0 : index
    %c32 = arith.constant 32 : index
    %65 = vector.load %arg7[%c0_76, %c0_77, %c32] : memref<2x4x290xf32, #tpu.memory_space<vmem>>, vector<1x4x256xf32>
    %66 = vector.shape_cast %65 : vector<1x4x256xf32> to vector<4x256xf32>
    %c0_78 = arith.constant 0 : index
    %c0_79 = arith.constant 0 : index
    %67 = vector.load %arg4[%c0_78, %c0_79] : memref<3x256xf32, #tpu.memory_space<vmem>>, vector<1x256xf32>
    %68 = vector.broadcast %67 : vector<1x256xf32> to vector<4x256xf32>
    %69 = arith.mulf %66, %68 : vector<4x256xf32>
    %c24 = arith.constant 24 : index
    %c0_80 = arith.constant 0 : index
    %70 = vector.load %arg8[%c24, %c0_80] : memref<36x512xf32, #tpu.memory_space<vmem>>, vector<4x256xf32>
    tpu.vector_store %arg8[%c24, %c0_80], %69 {strides = array<i32>} : memref<36x512xf32, #tpu.memory_space<vmem>>, vector<4x256xf32>,
    %c1_81 = arith.constant 1 : index
    %c0_82 = arith.constant 0 : index
    %c32_83 = arith.constant 32 : index
    %71 = vector.load %arg7[%c1_81, %c0_82, %c32_83] : memref<2x4x290xf32, #tpu.memory_space<vmem>>, vector<1x4x256xf32>
    %72 = vector.shape_cast %71 : vector<1x4x256xf32> to vector<4x256xf32>
    %c0_84 = arith.constant 0 : index
    %c0_85 = arith.constant 0 : index
    %73 = vector.load %arg4[%c0_84, %c0_85] : memref<3x256xf32, #tpu.memory_space<vmem>>, vector<1x256xf32>
    %74 = vector.broadcast %73 : vector<1x256xf32> to vector<4x256xf32>
    %75 = arith.mulf %72, %74 : vector<4x256xf32>
    %c24_86 = arith.constant 24 : index
    %c256_87 = arith.constant 256 : index
    %76 = vector.load %arg8[%c24_86, %c256_87] : memref<36x512xf32, #tpu.memory_space<vmem>>, vector<4x256xf32>
    tpu.vector_store %arg8[%c24_86, %c256_87], %75 {strides = array<i32>} : memref<36x512xf32, #tpu.memory_space<vmem>>, vector<4x256xf32>,
    %c0_88 = arith.constant 0 : index
    %c0_89 = arith.constant 0 : index
    %c33 = arith.constant 33 : index
    %77 = vector.load %arg7[%c0_88, %c0_89, %c33] : memref<2x4x290xf32, #tpu.memory_space<vmem>>, vector<1x4x256xf32>
    %78 = vector.shape_cast %77 : vector<1x4x256xf32> to vector<4x256xf32>
    %c28 = arith.constant 28 : index
    %c0_90 = arith.constant 0 : index
    %79 = vector.load %arg8[%c28, %c0_90] : memref<36x512xf32, #tpu.memory_space<vmem>>, vector<4x256xf32>
    tpu.vector_store %arg8[%c28, %c0_90], %78 {strides = array<i32>} : memref<36x512xf32, #tpu.memory_space<vmem>>, vector<4x256xf32>,
    %c1_91 = arith.constant 1 : index
    %c0_92 = arith.constant 0 : index
    %c33_93 = arith.constant 33 : index
    %80 = vector.load %arg7[%c1_91, %c0_92, %c33_93] : memref<2x4x290xf32, #tpu.memory_space<vmem>>, vector<1x4x256xf32>
    %81 = vector.shape_cast %80 : vector<1x4x256xf32> to vector<4x256xf32>
    %c28_94 = arith.constant 28 : index
    %c256_95 = arith.constant 256 : index
    %82 = vector.load %arg8[%c28_94, %c256_95] : memref<36x512xf32, #tpu.memory_space<vmem>>, vector<4x256xf32>
    tpu.vector_store %arg8[%c28_94, %c256_95], %81 {strides = array<i32>} : memref<36x512xf32, #tpu.memory_space<vmem>>, vector<4x256xf32>,
    %c0_96 = arith.constant 0 : index
    %c0_97 = arith.constant 0 : index
    %c34 = arith.constant 34 : index
    %83 = vector.load %arg7[%c0_96, %c0_97, %c34] : memref<2x4x290xf32, #tpu.memory_space<vmem>>, vector<1x4x256xf32>
    %84 = vector.shape_cast %83 : vector<1x4x256xf32> to vector<4x256xf32>
    %c2_98 = arith.constant 2 : index
    %c0_99 = arith.constant 0 : index
    %85 = vector.load %arg4[%c2_98, %c0_99] : memref<3x256xf32, #tpu.memory_space<vmem>>, vector<1x256xf32>
    %86 = vector.broadcast %85 : vector<1x256xf32> to vector<4x256xf32>
    %87 = arith.mulf %84, %86 : vector<4x256xf32>
    %c32_100 = arith.constant 32 : index
    %c0_101 = arith.constant 0 : index
    %88 = vector.load %arg8[%c32_100, %c0_101] : memref<36x512xf32, #tpu.memory_space<vmem>>, vector<4x256xf32>
    tpu.vector_store %arg8[%c32_100, %c0_101], %87 {strides = array<i32>} : memref<36x512xf32, #tpu.memory_space<vmem>>, vector<4x256xf32>,
    %c1_102 = arith.constant 1 : index
    %c0_103 = arith.constant 0 : index
    %c34_104 = arith.constant 34 : index
    %89 = vector.load %arg7[%c1_102, %c0_103, %c34_104] : memref<2x4x290xf32, #tpu.memory_space<vmem>>, vector<1x4x256xf32>
    %90 = vector.shape_cast %89 : vector<1x4x256xf32> to vector<4x256xf32>
    %c2_105 = arith.constant 2 : index
    %c0_106 = arith.constant 0 : index
    %91 = vector.load %arg4[%c2_105, %c0_106] : memref<3x256xf32, #tpu.memory_space<vmem>>, vector<1x256xf32>
    %92 = vector.broadcast %91 : vector<1x256xf32> to vector<4x256xf32>
    %93 = arith.mulf %90, %92 : vector<4x256xf32>
    %c32_107 = arith.constant 32 : index
    %c256_108 = arith.constant 256 : index
    %94 = vector.load %arg8[%c32_107, %c256_108] : memref<36x512xf32, #tpu.memory_space<vmem>>, vector<4x256xf32>
    tpu.vector_store %arg8[%c32_107, %c256_108], %93 {strides = array<i32>} : memref<36x512xf32, #tpu.memory_space<vmem>>, vector<4x256xf32>,
    %c0_109 = arith.constant 0 : index
    %c0_110 = arith.constant 0 : index
    %95 = vector.load %arg2[%c0_109, %c0_110] : memref<8x36xf32, #tpu.memory_space<vmem>>, vector<8x36xf32>
    %c0_111 = arith.constant 0 : index
    %c0_112 = arith.constant 0 : index
    %96 = vector.load %arg8[%c0_111, %c0_112] : memref<36x512xf32, #tpu.memory_space<vmem>>, vector<36x512xf32>
    %cst_113 = arith.constant dense<0.000000e+00> : vector<8x512xf32>
    %97 = tpu.matmul %95, %96, %cst_113 {dimension_numbers = #tpu.dot_dimension_numbers<[1], [0], [0], [1], [0, 0, 1, 1], [], []>} : vector<8x36xf32>, vector<36x512xf32>, vector<8x512xf32> -> vector<8x512xf32>
    %c0_114 = arith.constant 0 : index
    %c0_115 = arith.constant 0 : index
    %98 = vector.load %arg3[%c0_114, %c0_115] : memref<8x1xf32, #tpu.memory_space<vmem>>, vector<8x1xf32>
    %99 = vector.broadcast %98 : vector<8x1xf32> to vector<8x512xf32>
    %100 = arith.addf %97, %99 : vector<8x512xf32>
    %cst_116 = arith.constant 0.000000e+00 : f32
    %101 = vector.broadcast %cst_116 : f32 to vector<8x512xf32>
    %102 = arith.maximumf %100, %101 : vector<8x512xf32>
    %c0_117 = arith.constant 0 : index
    %c0_118 = arith.constant 0 : index
    %103 = vector.load %arg5[%c0_117, %c0_118] : memref<512x2xf32, #tpu.memory_space<vmem>>, vector<512x2xf32>
    %cst_119 = arith.constant dense<0.000000e+00> : vector<8x2xf32>
    %104 = tpu.matmul %102, %103, %cst_119 {dimension_numbers = #tpu.dot_dimension_numbers<[1], [0], [0], [1], [0, 0, 1, 1], [], []>} : vector<8x512xf32>, vector<512x2xf32>, vector<8x2xf32> -> vector<8x2xf32>
    %105 = vector.shape_cast %104 : vector<8x2xf32> to vector<1x8x2xf32>
    %c0_120 = arith.constant 0 : index
    %c0_121 = arith.constant 0 : index
    %c0_122 = arith.constant 0 : index
    %106 = vector.load %arg6[%c0_120, %c0_121, %c0_122] : memref<1x8x2xf32, #tpu.memory_space<vmem>>, vector<1x8x2xf32>
    tpu.vector_store %arg6[%c0_120, %c0_121, %c0_122], %105 {strides = array<i32>} : memref<1x8x2xf32, #tpu.memory_space<vmem>>, vector<1x8x2xf32>,
    return
  }
  func.func @transform_0(%arg0: i32) -> (i32, i32, i32) {
    %c0_i32 = arith.constant 0 : i32
    %c0_i32_0 = arith.constant 0 : i32
    %c0_i32_1 = arith.constant 0 : i32
    return %arg0, %c0_i32, %c0_i32_0 : i32, i32, i32
  }
  func.func @transform_1(%arg0: i32) -> (i32, i32) {
    %c0_i32 = arith.constant 0 : i32
    %c0_i32_0 = arith.constant 0 : i32
    %c0_i32_1 = arith.constant 0 : i32
    return %c0_i32, %c0_i32_0 : i32, i32
  }
  func.func @transform_2(%arg0: i32) -> (i32, i32) {
    %c0_i32 = arith.constant 0 : i32
    %c0_i32_0 = arith.constant 0 : i32
    %c0_i32_1 = arith.constant 0 : i32
    return %c0_i32, %c0_i32_0 : i32, i32
  }
  func.func @transform_3(%arg0: i32) -> (i32, i32) {
    %c0_i32 = arith.constant 0 : i32
    %c0_i32_0 = arith.constant 0 : i32
    %c0_i32_1 = arith.constant 0 : i32
    return %c0_i32, %c0_i32_0 : i32, i32
  }
  func.func @transform_4(%arg0: i32) -> (i32, i32) {
    %c0_i32 = arith.constant 0 : i32
    %c0_i32_0 = arith.constant 0 : i32
    %c0_i32_1 = arith.constant 0 : i32
    return %c0_i32, %c0_i32_0 : i32, i32
  }
  func.func @transform_5(%arg0: i32) -> (i32, i32, i32) {
    %c0_i32 = arith.constant 0 : i32
    %c0_i32_0 = arith.constant 0 : i32
    %c0_i32_1 = arith.constant 0 : i32
    return %arg0, %c0_i32, %c0_i32_0 : i32, i32, i32
  }
}

</mosaic_0001>

<bundles_post_ra>
// kernel: tpu_custom_call.1
= control target key start
LH: loop header
LB: loop body
LE: loop exit
PB: predicated region body
PF: predicated region fallthrough
CT: control target
= control target key end

     0   :  { %v53_v0 = vlaneseq  ;;  %vm20_vm0 = vcmask 134144   ;;  %vm23_vm1 = vcmask 273544   ;;  %v1157_v2 = vmov 0.0   ;;  %s1158_s20 = smov 17   ;;  %s1159_s9 = smov 2   ;;  %s1616_s0 = inlined_call_operand.vmem [shape: f32[2,4,256], index: 0, kind: input, shape index: {}]   ;;  %s1617_s3 = inlined_call_operand.vmem [shape: f32[3,256], index: 3, kind: input, shape index: {}]   ;;  %s1618_s2 = inlined_call_operand.vmem [shape: f32[8,1], index: 2, kind: input, shape index: {}]   ;;  %s1619_s4 = inlined_call_operand.vmem [shape: f32[512,2], index: 4, kind: input, shape index: {}]   ;;  %s1620_s1 = inlined_call_operand.vmem [shape: f32[8,36], index: 1, kind: input, shape index: {}]   ;;  %s1621_s5 = inlined_call_operand.vmem [shape: f32[1,8,2], index: 5, kind: output, shape index: {}]  }
   0x1   :  { %v26_v1 = vld [vmem:[%s1616_s0] sm:$0xff]  ;;  %21 = vst.msk [vmem:[#allocation2] sm:$0xf] %vm20_vm0, %v1157_v2  ;;  %22 = vst.msk [vmem:[#allocation2 + $0xc] sm:$0xf] %vm20_vm0, %v1157_v2  ;;  %752 = vmatprep.mubr.f32.mxu1 %v1157_v2  ;;  %681 = vmatprep.mubr.f32.mxu0 %v1157_v2  ;;  %v27_v3 = vld [vmem:[%s1616_s0 + $0x8] sm:$0xff] }
   0x2   :  { %24 = vst.msk [vmem:[#allocation2 + $0x8] sm:$0xf] %vm23_vm1, %v1157_v2  ;;  %25 = vst.msk [vmem:[#allocation2 + $0x14] sm:$0xf] %vm23_vm1, %v1157_v2  ;;  %30 = vrot.lane.b32.xlu0 %v26_v1, %s1158_s20  ;;  %v54_v4 = vshrl.u32 %v53_v0, 7  ;;  %s1160_s10 = smov 16  }
   0x3   :  { %v972_v5 = vld [vmem:[%s1617_s3 + $0x2] ss:$4 sm:$0x3]  ;;  %v203_v6 = vld [vmem:[%s1617_s3] ss:$4 sm:$0x3] }
   0x4   :  { %v973_v7 = vld [vmem:[%s1617_s3 + $0x2] ss:$4 sm:$0x3]  ;;  %v55_v8 = vsub.s32 0, %v54_v4  ;;  %v59_v9 = vsub.s32 1, %v54_v4  ;;  %s1161_s19 = smov 32  }
   0x5   :  { %v390_v10 = vld [vmem:[%s1617_s3] ss:$4 sm:$0x3]  ;;  %v974_v20 = vld [vmem:[%s1617_s3 + $0x2] ss:$4 sm:$0x3] }
   0x6   :  { %32 = vrot.lane.b32.xlu0 %v27_v3, %s1158_s20  ;;  %v134_v11 = vrot.slane %v972_v5, %v55_v8  ;;  %v138_v12 = vrot.slane %v972_v5, %v59_v9  ;;  %v208_v13 = vrot.slane %v203_v6, %v55_v8  ;;  %v212_v14 = vrot.slane %v203_v6, %v59_v9  ;;  %v242_v15 = vld [vmem:[%s1617_s3] ss:$4 sm:$0x3]  ;;  %v976_v30 = vld [vmem:[%s1617_s3 + $0x2] ss:$4 sm:$0x3] }
   0x7   :  { %v172_v16 = vrot.slane %v973_v7, %v55_v8  ;;  %v176_v17 = vrot.slane %v973_v7, %v59_v9  ;;  %v395_v18 = vrot.slane %v390_v10, %v55_v8  ;;  %v399_v19 = vrot.slane %v390_v10, %v59_v9  ;;  %v428_v29 = vld [vmem:[%s1617_s3] ss:$4 sm:$0x3]  ;;  %v975_v39 = vld [vmem:[%s1617_s3 + $0x2] ss:$4 sm:$0x3] }
   0x8   :  { %v139_v21 = vcombine.low %v134_v11, %v138_v12  ;;  %v213_v22 = vcombine.low %v208_v13, %v212_v14  ;;  %v247_v24 = vrot.slane %v242_v15, %v55_v8  ;;  %v251_v25 = vrot.slane %v242_v15, %v59_v9  ;;  %v51_v31 = vld [vmem:[%s1617_s3] ss:$4 sm:$0x3]  ;;  %s1162_s22 = smov 18   ;;  %s1163_s25 = smov 34  }
   0x9   :  { %v177_v23 = vcombine.low %v172_v16, %v176_v17  ;;  %v400_v26 = vcombine.low %v395_v18, %v399_v19  ;;  %v319_v27 = vrot.slane %v974_v20, %v55_v8  ;;  %v323_v28 = vrot.slane %v974_v20, %v59_v9  ;;  %v71_v35 = vld [vmem:[%s1617_s3] ss:$4 sm:$0x3]  ;;  %v977_v50 = vld [vmem:[%s1617_s3 + $0x2] ss:$4 sm:$0x3] }
   0xa   :  { %140 = vrot.lane.b32.xlu1 %v139_v21, %s1159_s9  ;;  %214 = vrot.lane.b32.xlu0 %v213_v22, %s1160_s10  ;;  %v252_v32 = vcombine.low %v247_v24, %v251_v25  ;;  %v433_v33 = vrot.slane %v428_v29, %v55_v8  ;;  %v437_v34 = vrot.slane %v428_v29, %v59_v9  ;;  %vm43_vm2 = vcmask 1043592   ;;  %s1164_s3 = smov 111   ;;  %s1165_s26 = smov 127  }
   0xb   :  { %v324_v36 = vcombine.low %v319_v27, %v323_v28  ;;  %v506_v37 = vrot.slane %v976_v30, %v55_v8  ;;  %v510_v38 = vrot.slane %v976_v30, %v59_v9  ;;  %v56_v40 = vrot.slane %v51_v31, %v55_v8  ;;  %s1166_s27 = smov 95   ;;  %s1167_s28 = smov 126  }
   0xc   :  { %v60_v41 = vrot.slane %v51_v31, %v59_v9  ;;  %v76_v42 = vrot.slane %v71_v35, %v55_v8  ;;  %v80_v43 = vrot.slane %v71_v35, %v59_v9  ;;  %v438_v44 = vcombine.low %v433_v33, %v437_v34  ;;  %s1168_s29 = smov 112   ;;  %s1169_s30 = smov 96  }
   0xd   :  { %v358_v45 = vrot.slane %v975_v39, %v55_v8  ;;  %v511_v47 = vcombine.low %v506_v37, %v510_v38  ;;  %v362_v48 = vrot.slane %v975_v39, %v59_v9  ;;  %v544_v52 = vrot.slane %v977_v50, %v55_v8  ;;  %s1170_s0 = smov 94   ;;  %s1171_s6 = smov 110  }
   0xe   :  { %178 = vrot.lane.b32.xlu1 %v177_v23, %s1159_s9  ;;  %401 = vrot.lane.b32.xlu0 %v400_v26, %s1161_s19  ;;  %v61_v46 = vcombine.low %v56_v40, %v60_v41  ;;  %v81_v49 = vcombine.low %v76_v42, %v80_v43  ;;  %v548_v53 = vrot.slane %v977_v50, %v59_v9  ;;  %vm44_vm3 = vcmask 1047556  }
   0xf   :  { %v363_v51 = vcombine.low %v358_v45, %v362_v48  ;;  %vm36_vm4 = vcmask 138240   ;;  %vm45_vm5 = vmor %vm44_vm3, %vm43_vm2  ;;  %vm217_vm6 = vcmask 130048   ;;  %vm143_vm7 = vcmask 15360  }
  0x10   :  { %v549_v54 = vcombine.low %v544_v52, %v548_v53  ;;  %vm328_vm8 = vcmask 146432   ;;  %vm404_vm9 = vcmask 261120   ;;  %vm515_vm10 = vcmask 277504  }
  0x11   :  { %vm101_vm11 = vcmask 1039360   ;;  %vm474_vm12 = vcmask 777216   ;;  %vm288_vm13 = vcmask 908288   ;;  %vm158_vm14 = vcmask 1031168  }
  0x12   :  { %253 = vrot.lane.b32.xlu1 %v252_v32, %s1160_s10  ;;  %325 = vrot.lane.b32.xlu0 %v324_v36, %s1162_s22  ;;  %vm233_vm15 = vcmask 916480   ;;  %vm419_vm1 = vcmask 785408   ;;  %vm530_vm2 = vcmask 769024   ;;  %vm604_vm3 = vcmask 1043456  }
  0x16   :  { %439 = vrot.lane.b32.xlu1 %v438_v44, %s1161_s19  ;;  %512 = vrot.lane.b32.xlu0 %v511_v47, %s1163_s25 }
  0x1a   :  { %364 = vrot.lane.b32.xlu1 %v363_v51, %s1162_s22 }
  0x1e   :  { %550 = vrot.lane.b32.xlu1 %v549_v54, %s1163_s25 }
  0x74   :  { %v31_v55 = vpop.permute.xlu0 %30 }
  0x75   :  { %v34_v56 = vrot.slane %v31_v55, 4 }
  0x77   :  { %v37_v57 = vsel %vm36_vm4, %v34_v56, %v31_v55  ;;  %47 = vst.msk [vmem:[#allocation2 + $0x8] sm:$0xf] %vm20_vm0, %v34_v56 }
  0x78   :  { %46 = vst.msk [vmem:[#allocation2] sm:$0xff] %vm45_vm5, %v37_v57  ;;  %v33_v58 = vpop.permute.xlu0 %32 }
  0x79   :  { %v35_v59 = vrot.slane %v33_v58, 4 }
  0x7b   :  { %v38_v60 = vsel %vm36_vm4, %v35_v59, %v33_v58  ;;  %49 = vst.msk [vmem:[#allocation2 + $0x14] sm:$0xf] %vm20_vm0, %v35_v59  ;;  %vm344_vm0 = vcmask 900096   ;;  %vm600_vm4 = vcmask 293888  }
  0x7c   :  { %48 = vst.msk [vmem:[#allocation2 + $0xc] sm:$0xff] %vm45_vm5, %v38_v60  ;;  %v141_v63 = vpop.permute.xlu1 %140  ;;  %v1265_v6 = vpop.permute.xlu0 %214 }
  0x7d   :  { %v216_v9 = vrot.slane %v1265_v6, 4  ;;  %v142_v11 = vrot.slane %v141_v63, 4 }
  0x7e   :  { %v278_v61 = vld [vmem:[#allocation2 + $0x8] sm:$0xf] }
  0x7f   :  { %v1249_v62 = vld [vmem:[#allocation2] sm:$0xff]  ;;  %286 = vrot.lane.b32.xlu1 %v278_v61, %s1164_s3  ;;  %v1153_v8 = vld [vmem:[#allocation2 + $0x8] ss:$0 sps:$4 sm:$0xff]   ;;  %v218_v14 = vsel %vm217_vm6, %v216_v9, %v1265_v6  ;;  %v144_v30 = vsel %vm143_vm7, %v142_v11, %v141_v63 }
  0x80   :  { %97 = vrot.lane.b32.xlu0 %v1249_v62, %s1165_s26  ;;  %v63_v0 = vmul.f32 %v61_v46, %v1249_v62  ;;  %v1261_v5 = vpop.permute.xlu1 %178  ;;  %v127_v13 = vld [vmem:[#allocation2 + $0x8] sm:$0xf]  ;;  %v1284_v18 = vmul.f32 %v218_v14, %v1249_v62  ;;  %v402_v20 = vpop.permute.xlu0 %401  ;;  %v93_v29 = vcombine.low %v1249_v62, %v1249_v62  ;;  %v147_v34 = vmul.f32 %v144_v30, %v1249_v62 }
  0x81   :  { %v148_v16 = vmul.f32 %v142_v11, %v127_v13  ;;  %v180_v17 = vrot.slane %v1261_v5, 4  ;;  %v403_v23 = vrot.slane %v402_v20, 4  ;;  %v389_v26 = vld [vmem:[#allocation2 + $0x8] sm:$0xf]  ;;  %v281_v37 = vcombine.high %v1249_v62, %v1249_v62 }
  0x82   :  { %v296_v1 = vld [vmem:[#allocation2 + $0x14] sm:$0xf]  ;;  %67 = vst [vmem:[#allocation3] sm:$0xf] %v63_v0  ;;  %v65_v3 = vcombine.high %v63_v0, %v63_v0  ;;  %v1155_v35 = vld [vmem:[#allocation2 + $0x8] ss:$0 sps:$4 sm:$0xff]   ;;  %v151_v59 = vcombine.high %v147_v34, %v147_v34 }
  0x83   :  { %v1255_v2 = vld [vmem:[#allocation2 + $0xc] sm:$0xff]  ;;  %304 = vrot.lane.b32.xlu1 %v296_v1, %s1164_s3  ;;  %v1154_v12 = vld [vmem:[#allocation2 + $0x14] ss:$0 sps:$4 sm:$0xff]   ;;  %v409_v27 = vmul.f32 %v403_v23, %v389_v26  ;;  %v500_v45 = vld [vmem:[#allocation2 + $0x8] sm:$0xf]  ;;  %v181_v50 = vsel %vm143_vm7, %v180_v17, %v1261_v5  ;;  %v405_v52 = vsel %vm404_vm9, %v403_v23, %v402_v20  ;;  %v225_v5 = vcombine.low %v1284_v18, %v1284_v18 }
  0x84   :  { %116 = vrot.lane.b32.xlu0 %v1255_v2, %s1165_s26  ;;  %v83_v4 = vmul.f32 %v81_v49, %v1255_v2  ;;  %68 = vst [vmem:[#allocation3 + $0x8] sm:$0xf] %v65_v3  ;;  %v1271_v10 = vpop.permute.xlu1 %253  ;;  %v166_v19 = vld [vmem:[#allocation2 + $0x14] sm:$0xf]  ;;  %v326_v31 = vpop.permute.xlu0 %325  ;;  %v299_v42 = vcombine.high %v1255_v2, %v1255_v2  ;;  %v112_v49 = vcombine.low %v1255_v2, %v1255_v2  ;;  %v202_v57 = vld [vmem:[#allocation2 + $0x8] sm:$0xf] }
  0x85   :  { %v255_v15 = vrot.slane %v1271_v10, 4  ;;  %v185_v22 = vmul.f32 %v180_v17, %v166_v19  ;;  %v427_v32 = vld [vmem:[#allocation2 + $0x14] sm:$0xf]  ;;  %v327_v38 = vrot.slane %v326_v31, 4  ;;  %v184_v53 = vmul.f32 %v181_v50, %v1255_v2  ;;  %v313_v1 = vld [vmem:[#allocation2 + $0x8] sm:$0xf] }
  0x86   :  { %87 = vst [vmem:[#allocation3 + $0x10] sm:$0xf] %v83_v4  ;;  %v85_v7 = vcombine.high %v83_v4, %v83_v4  ;;  %v1156_v41 = vld [vmem:[#allocation2 + $0x14] ss:$0 sps:$4 sm:$0xff]   ;;  %v408_v54 = vmul.f32 %v405_v52, %v1249_v62  ;;  %v222_v58 = vmul.f32 %v216_v9, %v202_v57 }
  0x87   :  { %300 = vrot.lane.b32.xlu1 %v1255_v2, %s1164_s3  ;;  %v256_v21 = vsel %vm217_vm6, %v255_v15, %v1271_v10  ;;  %v329_v43 = vsel %vm328_vm8, %v327_v38, %v326_v31  ;;  %v241_v60 = vld [vmem:[#allocation2 + $0x14] sm:$0xf]  ;;  %v188_v0 = vcombine.high %v184_v53, %v184_v53  ;;  %v333_v3 = vmul.f32 %v327_v38, %v313_v1 }
  0x88   :  { %470 = vrot.lane.b32.xlu0 %v1249_v62, %s1166_s27  ;;  %88 = vst [vmem:[#allocation3 + $0x18] sm:$0xf] %v85_v7  ;;  %v1293_v24 = vmul.f32 %v256_v21, %v1255_v2  ;;  %v440_v25 = vpop.permute.xlu1 %439  ;;  %v1306_v36 = vpop.permute.xlu0 %512  ;;  %v332_v47 = vmul.f32 %v329_v43, %v1249_v62  ;;  %v260_v61 = vmul.f32 %v255_v15, %v241_v60  ;;  %v352_v6 = vld [vmem:[#allocation2 + $0x14] sm:$0xf] }
  0x89   :  { %v441_v28 = vrot.slane %v440_v25, 4  ;;  %v514_v40 = vrot.slane %v1306_v36, 4  ;;  %v226_v63 = vcombine.low %v222_v58, %v222_v58  ;;  %v412_v9 = vcombine.high %v408_v54, %v408_v54 }
  0x8a   :  { %v264_v4 = vcombine.low %v260_v61, %v260_v61  ;;  %v263_v15 = vcombine.low %v1293_v24, %v1293_v24  ;;  %v336_v17 = vcombine.low %v332_v47, %v332_v47 }
  0x8b   :  { %99 = vrot.lane.b32.xlu1 %v1153_v8, %s1165_s26  ;;  %v446_v33 = vmul.f32 %v441_v28, %v427_v32  ;;  %v520_v46 = vmul.f32 %v514_v40, %v500_v45  ;;  %v442_v55 = vsel %vm404_vm9, %v441_v28, %v440_v25  ;;  %v337_v8 = vcombine.low %v333_v3, %v333_v3 }
  0x8c   :  { %489 = vrot.lane.b32.xlu0 %v1255_v2, %s1166_s27  ;;  %v365_v39 = vpop.permute.xlu1 %364  ;;  %v445_v56 = vmul.f32 %v442_v55, %v1255_v2  ;;  %v516_v13 = vsel %vm515_vm10, %v514_v40, %v1306_v36 }
  0x8d   :  { %v366_v44 = vrot.slane %v365_v39, 4 }
  0x8f   :  { %118 = vrot.lane.b32.xlu1 %v1154_v12, %s1165_s26  ;;  %v367_v48 = vsel %vm328_vm8, %v366_v44, %v365_v39  ;;  %v371_v7 = vmul.f32 %v366_v44, %v352_v6  ;;  %v449_v12 = vcombine.high %v445_v56, %v445_v56 }
  0x90   :  { %282 = vrot.lane.b32.xlu0 %v1249_v62, %s1164_s3  ;;  %v370_v51 = vmul.f32 %v367_v48, %v1255_v2  ;;  %v551_v10 = vpop.permute.xlu1 %550 }
  0x91   :  { %v375_v11 = vcombine.low %v371_v7, %v371_v7  ;;  %v552_v14 = vrot.slane %v551_v10, 4 }
  0x92   :  { %v374_v19 = vcombine.low %v370_v51, %v370_v51 }
  0x93   :  { %156 = vrot.lane.b32.xlu1 %v148_v16, %s1167_s28  ;;  %v519_v16 = vmul.f32 %v516_v13, %v1249_v62  ;;  %v1172_v62 = vmov 0  }
  0x94   :  { %229 = vrot.lane.b32.xlu0 %v1284_v18, %s1168_s29  ;;  %v553_v18 = vsel %vm515_vm10, %v552_v14, %v551_v10 }
  0x95   :  { %v556_v20 = vmul.f32 %v553_v18, %v1255_v2  ;;  %v523_v21 = vcombine.high %v519_v16, %v519_v16  ;;  %1150 = vset.pattern.permute.xlu0 %v1172_v62  ;;  %v594_v2 = vld [vmem:[%s1618_s2] sm:$0xff] }
  0x97   :  { %193 = vrot.lane.b32.xlu1 %v185_v22, %s1167_s28  ;;  %v538_v22 = vld [vmem:[#allocation2 + $0x14] sm:$0xf]  ;;  %v560_v25 = vcombine.high %v556_v20, %v556_v20 }
  0x98   :  { %267 = vrot.lane.b32.xlu0 %v1293_v24, %s1168_s29  ;;  %v557_v23 = vmul.f32 %v552_v14, %v538_v22 }
  0x9b   :  { %417 = vrot.lane.b32.xlu1 %v409_v27, %s1169_s30 }
  0x9c   :  { %95 = vrot.lane.b32.xlu0 %v93_v29, %s1165_s26 }
  0x9f   :  { %454 = vrot.lane.b32.xlu1 %v446_v33, %s1169_s30 }
  0xa0   :  { %152 = vrot.lane.b32.xlu0 %v147_v34, %s1167_s28 }
  0xa3   :  { %472 = vrot.lane.b32.xlu1 %v1155_v35, %s1166_s27 }
  0xa4   :  { %284 = vrot.lane.b32.xlu0 %v281_v37, %s1164_s3 }
  0xa7   :  { %491 = vrot.lane.b32.xlu1 %v1156_v41, %s1166_s27 }
  0xa8   :  { %302 = vrot.lane.b32.xlu0 %v299_v42, %s1164_s3 }
  0xab   :  { %528 = vrot.lane.b32.xlu1 %v520_v46, %s1170_s0 }
  0xac   :  { %340 = vrot.lane.b32.xlu0 %v332_v47, %s1171_s6 }
  0xaf   :  { %114 = vrot.lane.b32.xlu1 %v112_v49, %s1165_s26 }
  0xb0   :  { %378 = vrot.lane.b32.xlu0 %v370_v51, %s1171_s6 }
  0xb3   :  { %189 = vrot.lane.b32.xlu1 %v184_v53, %s1167_s28 }
  0xb4   :  { %413 = vrot.lane.b32.xlu0 %v408_v54, %s1169_s30 }
  0xb7   :  { %450 = vrot.lane.b32.xlu1 %v445_v56, %s1169_s30 }
  0xb8   :  { %468 = vrot.lane.b32.xlu0 %v93_v29, %s1166_s27 }
  0xbb   :  { %487 = vrot.lane.b32.xlu1 %v112_v49, %s1166_s27 }
  0xbc   :  { %154 = vrot.lane.b32.xlu0 %v151_v59, %s1167_s28 }
  0xbf   :  { %231 = vrot.lane.b32.xlu1 %v226_v63, %s1168_s29 }
  0xc0   :  { %191 = vrot.lane.b32.xlu0 %v188_v0, %s1167_s28 }
  0xc3   :  { %269 = vrot.lane.b32.xlu1 %v264_v4, %s1168_s29 }
  0xc4   :  { %227 = vrot.lane.b32.xlu0 %v225_v5, %s1168_s29 }
  0xc7   :  { %342 = vrot.lane.b32.xlu1 %v337_v8, %s1171_s6 }
  0xc8   :  { %415 = vrot.lane.b32.xlu0 %v412_v9, %s1169_s30 }
  0xcb   :  { %380 = vrot.lane.b32.xlu1 %v375_v11, %s1171_s6 }
  0xcc   :  { %452 = vrot.lane.b32.xlu0 %v449_v12, %s1169_s30 }
  0xcf   :  { %265 = vrot.lane.b32.xlu1 %v263_v15, %s1168_s29 }
  0xd0   :  { %338 = vrot.lane.b32.xlu0 %v336_v17, %s1171_s6 }
  0xd3   :  { %376 = vrot.lane.b32.xlu1 %v374_v19, %s1171_s6 }
  0xd4   :  { %526 = vrot.lane.b32.xlu0 %v523_v21, %s1170_s0 }
  0xd7   :  { %565 = vrot.lane.b32.xlu1 %v557_v23, %s1170_s0 }
  0xd8   :  { %563 = vrot.lane.b32.xlu0 %v560_v25, %s1170_s0 }
  0xdb   :  { %561 = vrot.lane.b32.xlu1 %v556_v20, %s1170_s0 }
  0xdc   :  { %524 = vrot.lane.b32.xlu0 %v519_v16, %s1170_s0 }
  0xe0   :  { %597 = vperm.xlu0 %1150, %v594_v2  }
  0xf1   :  { %v287_v24 = vpop.permute.xlu1 %286 }
  0xf2   :  { %v98_v26 = vpop.permute.xlu0 %97 }
  0xf5   :  { %v305_v27 = vpop.permute.xlu1 %304 }
  0xf6   :  { %v117_v28 = vpop.permute.xlu0 %116 }
  0xf9   :  { %v301_v29 = vpop.permute.xlu1 %300 }
  0xfa   :  { %v471_v30 = vpop.permute.xlu0 %470 }
  0xfd   :  { %v100_v31 = vpop.permute.xlu1 %99 }
  0xfe   :  { %v103_v32 = vsel %vm101_vm11, %v98_v26, %v100_v31  ;;  %v490_v33 = vpop.permute.xlu0 %489 }
  0xff   :  { %107 = vst [vmem:[#allocation3 + $0x8] sm:$0xf0] %v103_v32 }
 0x101   :  { %v119_v34 = vpop.permute.xlu1 %118 }
 0x102   :  { %v121_v35 = vsel %vm101_vm11, %v117_v28, %v119_v34  ;;  %v283_v36 = vpop.permute.xlu0 %282 }
 0x103   :  { %125 = vst [vmem:[#allocation3 + $0x18] sm:$0xf0] %v121_v35 }
 0x105   :  { %v157_v37 = vpop.permute.xlu1 %156 }
 0x106   :  { %v230_v38 = vpop.permute.xlu0 %229  ;;  %v575_v21 = vld [vmem:[#allocation3 + $0x8] sm:$0xff] }
 0x109   :  { %v194_v39 = vpop.permute.xlu1 %193 }
 0x10a   :  { %v1368_v40 = vpop.permute.xlu0 %267 }
 0x10d   :  { %v1370_v41 = vpop.permute.xlu1 %417 }
 0x10e   :  { %v96_v42 = vpop.permute.xlu0 %95 }
 0x10f   :  { %v102_v43 = vsel %vm101_vm11, %v96_v42, %v98_v26 }
 0x110   :  { %106 = vst [vmem:[#allocation3] sm:$0xf0] %v102_v43 }
 0x111   :  { %v1373_v44 = vpop.permute.xlu1 %454 }
 0x112   :  { %v153_v45 = vpop.permute.xlu0 %152 }
 0x115   :  { %v473_v46 = vpop.permute.xlu1 %472 }
 0x116   :  { %v476_v47 = vsel %vm474_vm12, %v471_v30, %v473_v46  ;;  %v285_v48 = vpop.permute.xlu0 %284 }
 0x117   :  { %480 = vst [vmem:[#allocation3 + $0x68] sm:$0xf0] %v476_v47  ;;  %v289_v49 = vsel %vm288_vm13, %v283_v36, %v285_v48  ;;  %v290_v50 = vsel %vm288_vm13, %v285_v48, %v287_v24  ;;  %v574_v32 = vld [vmem:[#allocation3] sm:$0xff] }
 0x118   :  { %293 = vst [vmem:[#allocation3 + $0x40] sm:$0xf] %v289_v49  ;;  %294 = vst [vmem:[#allocation3 + $0x48] sm:$0xf] %v290_v50 }
 0x119   :  { %v492_v51 = vpop.permute.xlu1 %491 }
 0x11a   :  { %v494_v52 = vsel %vm474_vm12, %v490_v33, %v492_v51  ;;  %v303_v53 = vpop.permute.xlu0 %302 }
 0x11b   :  { %498 = vst [vmem:[#allocation3 + $0x78] sm:$0xf0] %v494_v52  ;;  %v306_v54 = vsel %vm288_vm13, %v301_v29, %v303_v53  ;;  %v307_v55 = vsel %vm288_vm13, %v303_v53, %v305_v27  ;;  %v577_v27 = vld [vmem:[#allocation3 + $0x18] sm:$0xff] }
 0x11c   :  { %310 = vst [vmem:[#allocation3 + $0x50] sm:$0xf] %v306_v54  ;;  %311 = vst [vmem:[#allocation3 + $0x58] sm:$0xf] %v307_v55 }
 0x11d   :  { %v1377_v56 = vpop.permute.xlu1 %528 }
 0x11e   :  { %v1379_v57 = vpop.permute.xlu0 %340 }
 0x121   :  { %v115_v58 = vpop.permute.xlu1 %114 }
 0x122   :  { %v120_v59 = vsel %vm101_vm11, %v115_v58, %v117_v28  ;;  %v1382_v60 = vpop.permute.xlu0 %378 }
 0x123   :  { %124 = vst [vmem:[#allocation3 + $0x10] sm:$0xf0] %v120_v59 }
 0x125   :  { %v190_v61 = vpop.permute.xlu1 %189 }
 0x126   :  { %v414_v63 = vpop.permute.xlu0 %413 }
 0x129   :  { %v451_v0 = vpop.permute.xlu1 %450 }
 0x12a   :  { %v469_v1 = vpop.permute.xlu0 %468  ;;  %v576_v50 = vld [vmem:[#allocation3 + $0x10] sm:$0xff] }
 0x12b   :  { %v475_v3 = vsel %vm474_vm12, %v469_v1, %v471_v30 }
 0x12c   :  { %479 = vst [vmem:[#allocation3 + $0x60] sm:$0xf0] %v475_v3 }
 0x12d   :  { %v488_v4 = vpop.permute.xlu1 %487 }
 0x12e   :  { %v493_v5 = vsel %vm474_vm12, %v488_v4, %v490_v33  ;;  %v155_v6 = vpop.permute.xlu0 %154  ;;  %v811_v4 = vld [vmem:[%s1619_s4 + $0x180] sm:$0xff] }
 0x12f   :  { %497 = vst [vmem:[#allocation3 + $0x70] sm:$0xf0] %v493_v5  ;;  %v159_v7 = vsel %vm158_vm14, %v153_v45, %v155_v6  ;;  %v160_v8 = vsel %vm158_vm14, %v155_v6, %v157_v37  ;;  %v812_v5 = vld [vmem:[%s1619_s4 + $0x188] sm:$0xff]  ;;  %v779_v6 = vld [vmem:[%s1619_s4 + $0x80] sm:$0xff] }
 0x130   :  { %163 = vst [vmem:[#allocation3 + $0x20] sm:$0xf] %v159_v7  ;;  %164 = vst [vmem:[#allocation3 + $0x28] sm:$0xf] %v160_v8  ;;  %v780_v7 = vld [vmem:[%s1619_s4 + $0x88] sm:$0xff]  ;;  %v795_v8 = vld [vmem:[%s1619_s4 + $0x100] sm:$0xff] }
 0x131   :  { %v232_v9 = vpop.permute.xlu1 %231 }
 0x132   :  { %v235_v10 = vsel %vm233_vm15, %v230_v38, %v232_v9  ;;  %v192_v11 = vpop.permute.xlu0 %191 }
 0x133   :  { %239 = vst [vmem:[#allocation3 + $0x28] sm:$0xf0] %v235_v10  ;;  %v195_v12 = vsel %vm158_vm14, %v190_v61, %v192_v11  ;;  %v196_v13 = vsel %vm158_vm14, %v192_v11, %v194_v39  ;;  %v796_v10 = vld [vmem:[%s1619_s4 + $0x108] sm:$0xff]  ;;  %v763_v11 = vld [vmem:[%s1619_s4] sm:$0xff] }
 0x134   :  { %199 = vst [vmem:[#allocation3 + $0x30] sm:$0xf] %v195_v12  ;;  %200 = vst [vmem:[#allocation3 + $0x38] sm:$0xf] %v196_v13  ;;  %v764_v12 = vld [vmem:[%s1619_s4 + $0x8] sm:$0xff]  ;;  %v813_v13 = vld [vmem:[%s1619_s4 + $0x190] sm:$0xff] }
 0x135   :  { %v270_v14 = vpop.permute.xlu1 %269 }
 0x136   :  { %v272_v15 = vsel %vm233_vm15, %v1368_v40, %v270_v14  ;;  %v228_v16 = vpop.permute.xlu0 %227  ;;  %v814_v14 = vld [vmem:[%s1619_s4 + $0x198] sm:$0xff] }
 0x137   :  { %276 = vst [vmem:[#allocation3 + $0x38] sm:$0xf0] %v272_v15  ;;  %v234_v17 = vsel %vm233_vm15, %v228_v16, %v230_v38  ;;  %v573_v15 = vld [vmem:[%s1620_s1] sm:$0xff]  ;;  %v1102_v16 = vpack.c.bf16 %v812_v5, %v811_v4  ;;  %v789_v4 = vld [vmem:[%s1619_s4 + $0xd0] sm:$0xff]  ;;  %v790_v5 = vld [vmem:[%s1619_s4 + $0xd8] sm:$0xff] }
 0x138   :  { %238 = vst [vmem:[#allocation3 + $0x20] sm:$0xf0] %v234_v17  ;;  %v781_v17 = vld [vmem:[%s1619_s4 + $0x90] sm:$0xff] }
 0x139   :  { %v343_v18 = vpop.permute.xlu1 %342 }
 0x13a   :  { %v346_v19 = vsel %vm344_vm0, %v1379_v57, %v343_v18  ;;  %v416_v20 = vpop.permute.xlu0 %415  ;;  %v579_v22 = vld [vmem:[#allocation3 + $0x28] sm:$0xff]  ;;  %v782_v18 = vld [vmem:[%s1619_s4 + $0x98] sm:$0xff] }
 0x13b   :  { %350 = vst [vmem:[#allocation3 + $0x48] sm:$0xf0] %v346_v19  ;;  %v420_v23 = vsel %vm419_vm1, %v414_v63, %v416_v20  ;;  %v421_v25 = vsel %vm419_vm1, %v416_v20, %v1370_v41  ;;  %v1054_v62 = vpack.c.bf16 %v579_v22, %v575_v21  ;;  %v1070_v20 = vpack.c.bf16 %v780_v7, %v779_v6  ;;  %v797_v22 = vld [vmem:[%s1619_s4 + $0x110] sm:$0xff] }
 0x13c   :  { %424 = vst [vmem:[#allocation3 + $0x60] sm:$0xf] %v420_v23  ;;  %425 = vst [vmem:[#allocation3 + $0x68] sm:$0xf] %v421_v25  ;;  %v1104_v21 = vpack.c.bf16 %v796_v10, %v795_v8  ;;  %v1072_v25 = vpack.c.bf16 %v764_v12, %v763_v11  ;;  %v806_v10 = vld [vmem:[%s1619_s4 + $0x158] sm:$0xff]  ;;  %v773_v11 = vld [vmem:[%s1619_s4 + $0x50] sm:$0xff]  ;;  %v1090_v12 = vpack.c.bf16 %v790_v5, %v789_v4 }
 0x13d   :  { %v381_v2 = vpop.permute.xlu1 %380  ;;  %1055 = vmatprep.subr.bf16.mxu0 %v1054_v62  ;;  %v1106_v62 = vpack.c.bf16 %v814_v14, %v813_v13  ;;  %v774_v13 = vld [vmem:[%s1619_s4 + $0x58] sm:$0xff]  ;;  %v823_v14 = vld [vmem:[%s1619_s4 + $0x1e0] sm:$0xff] }
 0x13e   :  { %v383_v24 = vsel %vm344_vm0, %v1382_v60, %v381_v2  ;;  %v453_v26 = vpop.permute.xlu0 %452  ;;  %v581_v28 = vld [vmem:[#allocation3 + $0x38] sm:$0xff]  ;;  %v798_v2 = vld [vmem:[%s1619_s4 + $0x118] sm:$0xff] }
 0x13f   :  { %387 = vst [vmem:[#allocation3 + $0x58] sm:$0xf0] %v383_v24  ;;  %v456_v29 = vsel %vm419_vm1, %v451_v0, %v453_v26  ;;  %v457_v30 = vsel %vm419_vm1, %v453_v26, %v1373_v44  ;;  %v1062_v31 = vpack.c.bf16 %v581_v28, %v577_v27  ;;  %v578_v33 = vld [vmem:[#allocation3 + $0x20] sm:$0xff]  ;;  %v765_v24 = vld [vmem:[%s1619_s4 + $0x10] sm:$0xff]  ;;  %v1074_v26 = vpack.c.bf16 %v782_v18, %v781_v17  ;;  %v815_v28 = vld [vmem:[%s1619_s4 + $0x1a0] sm:$0xff] }
 0x140   :  { %460 = vst [vmem:[#allocation3 + $0x70] sm:$0xf] %v456_v29  ;;  %461 = vst [vmem:[#allocation3 + $0x78] sm:$0xf] %v457_v30  ;;  %v1056_v34 = vpack.c.bf16 %v578_v33, %v574_v32  ;;  %v766_v27 = vld [vmem:[%s1619_s4 + $0x18] sm:$0xff]  ;;  %v816_v29 = vld [vmem:[%s1619_s4 + $0x1a8] sm:$0xff]  ;;  %v1108_v32 = vpack.c.bf16 %v798_v2, %v797_v22  ;;  %v1092_v17 = vpack.c.bf16 %v774_v13, %v773_v11 }
 0x141   :  { %v266_v35 = vpop.permute.xlu1 %265  ;;  %1063 = vmatprep.subr.bf16.mxu1 %v1062_v31  ;;  %v783_v30 = vld [vmem:[%s1619_s4 + $0xa0] sm:$0xff]  ;;  %v784_v31 = vld [vmem:[%s1619_s4 + $0xa8] sm:$0xff]  ;;  %v1076_v33 = vpack.c.bf16 %v766_v27, %v765_v24  ;;  %v826_v27 = vld [vmem:[%s1619_s4 + $0x1f8] sm:$0xff] }
 0x142   :  { %v271_v36 = vsel %vm233_vm15, %v266_v35, %v1368_v40  ;;  %1057 = vmatpush1.bf16.msra.mxu0 %v1056_v34  ;;  %v339_v37 = vpop.permute.xlu0 %338  ;;  %v583_v38 = vld [vmem:[#allocation3 + $0x48] sm:$0xff]  ;;  %v1110_v34 = vpack.c.bf16 %v816_v29, %v815_v28  ;;  %v793_v29 = vld [vmem:[%s1619_s4 + $0xf0] sm:$0xff] }
 0x143   :  { %275 = vst [vmem:[#allocation3 + $0x30] sm:$0xf0] %v271_v36  ;;  %v345_v39 = vsel %vm344_vm0, %v339_v37, %v1379_v57  ;;  %v587_v41 = vld [vmem:[#allocation3 + $0x68] sm:$0xff]  ;;  %v586_v55 = vld [vmem:[#allocation3 + $0x60] sm:$0xff]  ;;  %v800_v36 = vld [vmem:[%s1619_s4 + $0x128] sm:$0xff] }
 0x144   :  { %349 = vst [vmem:[#allocation3 + $0x40] sm:$0xf0] %v345_v39  ;;  %v1058_v42 = vpack.c.bf16 %v587_v41, %v583_v38  ;;  %v799_v35 = vld [vmem:[%s1619_s4 + $0x120] sm:$0xff]  ;;  %v1078_v38 = vpack.c.bf16 %v784_v31, %v783_v30  ;;  %v768_v39 = vld [vmem:[%s1619_s4 + $0x28] sm:$0xff]  ;;  %v817_v41 = vld [vmem:[%s1619_s4 + $0x1b0] sm:$0xff] }
 0x145   :  { %v377_v43 = vpop.permute.xlu1 %376  ;;  %v767_v37 = vld [vmem:[%s1619_s4 + $0x20] sm:$0xff]  ;;  %v794_v30 = vld [vmem:[%s1619_s4 + $0xf8] sm:$0xff]  ;;  %v809_v31 = vld [vmem:[%s1619_s4 + $0x170] sm:$0xff] }
 0x146   :  { %v382_v44 = vsel %vm344_vm0, %v377_v43, %v1382_v60  ;;  %1059 = vmatprep.subr.bf16.mxu0 %v1058_v42  ;;  %v527_v45 = vpop.permute.xlu0 %526  ;;  %v585_v47 = vld [vmem:[#allocation3 + $0x58] sm:$0xff]  ;;  %v818_v42 = vld [vmem:[%s1619_s4 + $0x1b8] sm:$0xff] }
 0x147   :  { %386 = vst [vmem:[#allocation3 + $0x50] sm:$0xf0] %v382_v44  ;;  %v532_v40 = vsel %vm530_vm2, %v527_v45, %v1377_v56  ;;  %v589_v48 = vld [vmem:[#allocation3 + $0x78] sm:$0xff]  ;;  %v588_v63 = vld [vmem:[#allocation3 + $0x70] sm:$0xff]  ;;  %v786_v44 = vld [vmem:[%s1619_s4 + $0xb8] sm:$0xff] }
 0x148   :  { %536 = vst [vmem:[#allocation3 + $0x88] sm:$0xf] %v532_v40  ;;  %v1066_v58 = vpack.c.bf16 %v589_v48, %v585_v47  ;;  %v785_v43 = vld [vmem:[%s1619_s4 + $0xb0] sm:$0xff]  ;;  %v1080_v40 = vpack.c.bf16 %v768_v39, %v767_v37  ;;  %v802_v48 = vld [vmem:[%s1619_s4 + $0x138] sm:$0xff] }
 0x149   :  { %v566_v46 = vpop.permute.xlu1 %565  ;;  %v801_v47 = vld [vmem:[%s1619_s4 + $0x130] sm:$0xff] }
 0x14a   :  { %v564_v49 = vpop.permute.xlu0 %563  ;;  %v580_v51 = vld [vmem:[#allocation3 + $0x30] sm:$0xff] }
 0x14b   :  { %v568_v52 = vsel %vm530_vm2, %v564_v49, %v566_v46  ;;  %v1064_v53 = vpack.c.bf16 %v580_v51, %v576_v50  ;;  %v582_v54 = vld [vmem:[#allocation3 + $0x40] sm:$0xff]  ;;  %v1114_v46 = vpack.c.bf16 %v818_v42, %v817_v41  ;;  %v1082_v50 = vpack.c.bf16 %v786_v44, %v785_v43 }
 0x14c   :  { %572 = vst [vmem:[#allocation3 + $0x98] sm:$0xf] %v568_v52  ;;  %v1060_v57 = vpack.c.bf16 %v586_v55, %v582_v54  ;;  %v770_v51 = vld [vmem:[%s1619_s4 + $0x38] sm:$0xff]  ;;  %v819_v52 = vld [vmem:[%s1619_s4 + $0x1c0] sm:$0xff]  ;;  %v788_v55 = vld [vmem:[%s1619_s4 + $0xc8] sm:$0xff] }
 0x14d   :  { %v562_v59 = vpop.permute.xlu1 %561  ;;  %1065 = vmatpush1.bf16.msra.mxu1 %v1064_v53  ;;  %v820_v53 = vld [vmem:[%s1619_s4 + $0x1c8] sm:$0xff]  ;;  %v787_v54 = vld [vmem:[%s1619_s4 + $0xc0] sm:$0xff] }
 0x14e   :  { %v567_v56 = vsel %vm530_vm2, %v562_v59, %v564_v49  ;;  %1061 = vmatpush1.bf16.msra.mxu0 %v1060_v57  ;;  %1067 = vmatprep.subr.bf16.mxu1 %v1066_v58  ;;  %v525_v60 = vpop.permute.xlu0 %524  ;;  %v584_v61 = vld [vmem:[#allocation3 + $0x50] sm:$0xff]  ;;  %v769_v49 = vld [vmem:[%s1619_s4 + $0x30] sm:$0xff]  ;;  %v1116_v57 = vpack.c.bf16 %v802_v48, %v801_v47  ;;  %v1118_v59 = vpack.c.bf16 %v820_v53, %v819_v52 }
 0x14f   :  { %571 = vst [vmem:[#allocation3 + $0x90] sm:$0xf] %v567_v56  ;;  %v531_v0 = vsel %vm530_vm2, %v525_v60, %v527_v45  ;;  %v591_v1 = vld [vmem:[#allocation3 + $0x88] sm:$0xf]  ;;  %v1068_v3 = vpack.c.bf16 %v588_v63, %v584_v61  ;;  %v1112_v45 = vpack.c.bf16 %v800_v36, %v799_v35  ;;  %v1084_v58 = vpack.c.bf16 %v770_v51, %v769_v49  ;;  %v804_v60 = vld [vmem:[%s1619_s4 + $0x148] sm:$0xff]  ;;  %v778_v35 = vld [vmem:[%s1619_s4 + $0x78] sm:$0xff] }
 0x150   :  { %535 = vst [vmem:[#allocation3 + $0x80] sm:$0xf] %v531_v0  ;;  %978 = vmatprep.subr.msk.mxu0 %vm604_vm3, %v591_v1  ;;  %v803_v56 = vld [vmem:[%s1619_s4 + $0x140] sm:$0xff]  ;;  %v1086_v63 = vpack.c.bf16 %v788_v55, %v787_v54  ;;  %v772_v0 = vld [vmem:[%s1619_s4 + $0x48] sm:$0xff]  ;;  %v821_v1 = vld [vmem:[%s1619_s4 + $0x1d0] sm:$0xff] }
 0x151   :  { %1069 = vmatpush1.bf16.msra.mxu1 %v1068_v3  ;;  %v771_v61 = vld [vmem:[%s1619_s4 + $0x40] sm:$0xff]  ;;  %v822_v3 = vld [vmem:[%s1619_s4 + $0x1d8] sm:$0xff]  ;;  %v1120_v6 = vpack.c.bf16 %v804_v60, %v803_v56 }
 0x152   :  { %v1088_v7 = vpack.c.bf16 %v772_v0, %v771_v61  ;;  %v1122_v8 = vpack.c.bf16 %v822_v3, %v821_v1 }
 0x153   :  { %v593_v9 = vld [vmem:[#allocation3 + $0x98] sm:$0xf] }
 0x154   :  { %981 = vmatprep.subr.msk.mxu1 %vm604_vm3, %v593_v9  ;;  %v805_v9 = vld [vmem:[%s1619_s4 + $0x150] sm:$0xff] }
 0x156   :  { %v592_v19 = vld [vmem:[#allocation3 + $0x90] sm:$0xf] }
 0x157   :  { %982 = vmatpush1.msk.msra.mxu1 %vm604_vm3, %v592_v19  ;;  %v590_v23 = vld [vmem:[#allocation3 + $0x80] sm:$0xf]  ;;  %v791_v19 = vld [vmem:[%s1619_s4 + $0xe0] sm:$0xff] }
 0x158   :  { %979 = vmatpush1.msk.msra.mxu0 %vm604_vm3, %v590_v23  ;;  %983 = vmatmul.mubr.msk.f32.vlgmr.msra.gmra.mrb[0].mxu1 %vm600_vm4, %v573_v15  ;;  %v808_v23 = vld [vmem:[%s1619_s4 + $0x168] sm:$0xff] }
 0x159   :  { %980 = vmatmul.mubr.msk.f32.vlgmr.msra.gmra.mrb[0].mxu0 %vm600_vm4, %v573_v15  ;;  %1103 = vmatprep.subr.bf16.mxu1 %v1102_v16  ;;  %v824_v15 = vld [vmem:[%s1619_s4 + $0x1e8] sm:$0xff]  ;;  %v1124_v16 = vpack.c.bf16 %v806_v10, %v805_v9 }
 0x15a   :  { %1071 = vmatprep.subr.bf16.mxu0 %v1070_v20  ;;  %1105 = vmatpush3.bf16.msra.mxu1 %v1104_v21  ;;  %v1126_v18 = vpack.c.bf16 %v824_v15, %v823_v14  ;;  %v792_v20 = vld [vmem:[%s1619_s4 + $0xe8] sm:$0xff]  ;;  %v807_v21 = vld [vmem:[%s1619_s4 + $0x160] sm:$0xff] }
 0x15b   :  { %1073 = vmatpush3.bf16.msra.mxu0 %v1072_v25  ;;  %1107 = vmatprep.subr.bf16.mxu1 %v1106_v62  ;;  %v1094_v22 = vpack.c.bf16 %v792_v20, %v791_v19  ;;  %v775_v25 = vld [vmem:[%s1619_s4 + $0x60] sm:$0xff]  ;;  %v776_v62 = vld [vmem:[%s1619_s4 + $0x68] sm:$0xff]  ;;  %v1128_v2 = vpack.c.bf16 %v808_v23, %v807_v21 }
 0x15c   :  { %1075 = vmatprep.subr.bf16.mxu0 %v1074_v26  ;;  %v1096_v24 = vpack.c.bf16 %v776_v62, %v775_v25  ;;  %v825_v26 = vld [vmem:[%s1619_s4 + $0x1f0] sm:$0xff] }
 0x15d   :  { %v1130_v28 = vpack.c.bf16 %v826_v27, %v825_v26 }
 0x15e   :  { %1109 = vmatpush3.bf16.msra.mxu1 %v1108_v32  ;;  %v1098_v32 = vpack.c.bf16 %v794_v30, %v793_v29 }
 0x15f   :  { %1077 = vmatpush3.bf16.msra.mxu0 %v1076_v33  ;;  %1111 = vmatprep.subr.bf16.mxu1 %v1110_v34  ;;  %v810_v33 = vld [vmem:[%s1619_s4 + $0x178] sm:$0xff]  ;;  %v777_v34 = vld [vmem:[%s1619_s4 + $0x70] sm:$0xff] }
 0x160   :  { %1079 = vmatprep.subr.bf16.mxu0 %v1078_v38  ;;  %v1132_v36 = vpack.c.bf16 %v810_v33, %v809_v31  ;;  %v1100_v37 = vpack.c.bf16 %v778_v35, %v777_v34  ;;  %v598_v38 = vpop.permute.xlu0 %597 }
 0x162   :  { %1113 = vmatpush3.bf16.msra.mxu1 %v1112_v45 }
 0x163   :  { %1081 = vmatpush3.bf16.msra.mxu0 %v1080_v40  ;;  %1115 = vmatprep.subr.bf16.mxu1 %v1114_v46 }
 0x164   :  { %1083 = vmatprep.subr.bf16.mxu0 %v1082_v50 }
 0x166   :  { %1117 = vmatpush3.bf16.msra.mxu1 %v1116_v57 }
 0x167   :  { %1085 = vmatpush3.bf16.msra.mxu0 %v1084_v58  ;;  %1119 = vmatprep.subr.bf16.mxu1 %v1118_v59 }
 0x168   :  { %1087 = vmatprep.subr.bf16.mxu0 %v1086_v63 }
 0x16a   :  { %1121 = vmatpush3.bf16.msra.mxu1 %v1120_v6 }
 0x16b   :  { %1089 = vmatpush3.bf16.msra.mxu0 %v1088_v7  ;;  %1123 = vmatprep.subr.bf16.mxu1 %v1122_v8 }
 0x16c   :  { %1091 = vmatprep.subr.bf16.mxu0 %v1090_v12 }
 0x16e   :  { %1125 = vmatpush3.bf16.msra.mxu1 %v1124_v16 }
 0x16f   :  { %1093 = vmatpush3.bf16.msra.mxu0 %v1092_v17  ;;  %1127 = vmatprep.subr.bf16.mxu1 %v1126_v18 }
 0x170   :  { %1095 = vmatprep.subr.bf16.mxu0 %v1094_v22 }
 0x172   :  { %1129 = vmatpush3.bf16.msra.mxu1 %v1128_v2 }
 0x173   :  { %1097 = vmatpush3.bf16.msra.mxu0 %v1096_v24  ;;  %1131 = vmatprep.subr.bf16.mxu1 %v1130_v28 }
 0x174   :  { %1099 = vmatprep.subr.bf16.mxu0 %v1098_v32 }
 0x176   :  { %1133 = vmatpush3.bf16.msra.mxu1 %v1132_v36 }
 0x177   :  { %1101 = vmatpush3.bf16.msra.mxu0 %v1100_v37 }
 0x22b   :  { %v754_v39 = vpop.f32.mrb[0].mxu1 }
 0x22c   :  { %v683_v41 = vpop.f32.mrb[0].mxu0  ;;  %v756_v42 = vpop.f32.mrb[1].mxu1  ;;  %v755_v43 = vadd.f32 %v754_v39, %v598_v38 }
 0x22d   :  { %v684_v44 = vadd.f32 %v683_v41, %v598_v38  ;;  %v757_v45 = vadd.f32 %v756_v42, %v598_v38  ;;  %v685_v40 = vpop.f32.mrb[1].mxu0 }
 0x22e   :  { %v761_v46 = vmax.f32 %v755_v43, 0.0  ;;  %v686_v47 = vadd.f32 %v685_v40, %v598_v38 }
 0x22f   :  { %v762_v48 = vmax.f32 %v757_v45, 0.0  ;;  %v759_v50 = vmax.f32 %v684_v44, 0.0 }
 0x230   :  { %v760_v49 = vmax.f32 %v686_v47, 0.0 }
 0x231   :  { %961 = vmatprep.mubr.f32.mxu1 %v762_v48 }
 0x232   :  { %891 = vmatprep.mubr.f32.mxu0 %v760_v49  ;;  %962 = vmatmul.mubr.f32.vlgmr.msra.gmra.mrb[2].mxu1 %v761_v46 }
 0x233   :  { %892 = vmatmul.mubr.f32.vlgmr.msra.gmra.mrb[2].mxu0 %v759_v50 }
 0x305   :  { %v1051_v51 = vpop.f32.mrb[2].mxu1 }
 0x306   :  { %v1016_v52 = vpop.f32.mrb[2].mxu0  ;;  %v1052_v53 = vpop.f32.mrb[3].mxu1 }
 0x307   :  { %v1053_v54 = vadd.f32 %v1052_v53, %v1051_v51  ;;  %v1017_v55 = vpop.f32.mrb[3].mxu0 }
 0x308   :  { %v1018_v57 = vadd.f32 %v1017_v55, %v1016_v52 }
 0x30a   :  { %v964_v58 = vadd.f32 %v1053_v54, %v1018_v57 }
 0x30c   :  { %967 = vst.msk [vmem:[%s1621_s5] sm:$0xff] %vm143_vm7, %v964_v58 }

</bundles_post_ra>
